<compile_context>
chip_gen: v5e
topology: v5e:2x2
jax: 0.10.0
libtpu: 0.0.40
codegen_flags: <defaults>
</compile_context>

<pallas_src>
import functools

import jax
import jax.numpy as jnp
from jax import lax
from jax.experimental import pallas as pl
from jax.experimental.pallas import tpu as pltpu

LANES = 128
SUBLANES = 8
ROW_TILE_DEFAULT = 8192   # (8192, 128) f32 block = 4 MiB per input stream


def _chip_config():
    """Chip-dependent grid defaults: (num_core_splits, use_core_parallel)."""
    kind = ""
    try:
        kind = jax.devices()[0].device_kind.lower()
    except Exception:
        pass
    is_v7 = ("v7" in kind) or ("tpu7" in kind)
    # v7x has 2 TensorCores -> real cross-core sharding via CORE_PARALLEL.
    # v5e / v6e have 1 TC -> keep a single split (avoids clamped duplicate
    # DMA steps and a second output writeback).
    return (2, True) if is_v7 else (1, False)


def _wloss_kernel(pred_ref, label_ref, sum_pl_ref, sum_p_ref, *,
                  rows, row_tile, steps_per_split, need_mask):
    c = pl.program_id(0)
    i = pl.program_id(1)

    @pl.when(i == 0)
    def _():
        sum_pl_ref[...] = jnp.zeros_like(sum_pl_ref)
        sum_p_ref[...] = jnp.zeros_like(sum_p_ref)

    p = pred_ref[...].astype(jnp.float32)
    l = label_ref[...].astype(jnp.float32)
    prod = p * l

    def accumulate(p_v, prod_v):
        # Lane/sublane-parallel partial sums: pure VPU adds into (8, 128)
        # slabs that stay resident across the reduction axis.
        sum_pl_ref[...] += jnp.sum(prod_v.reshape(-1, SUBLANES, LANES), axis=0)
        sum_p_ref[...] += jnp.sum(p_v.reshape(-1, SUBLANES, LANES), axis=0)

    if not need_mask:
        accumulate(p, prod)
    else:
        block_idx = c * steps_per_split + i
        ragged = (block_idx + 1) * row_tile > rows

        @pl.when(jnp.logical_not(ragged))
        def _():
            accumulate(p, prod)

        @pl.when(ragged)
        def _():
            # Only the final ragged (or clamped-duplicate) step pays for the
            # iota + compare + where.  Mask the *product* (after the multiply)
            # so garbage in the stale region cannot poison the sums.
            row_ids = (block_idx * row_tile
                       + lax.broadcasted_iota(jnp.int32, (row_tile, LANES), 0))
            valid = row_ids < rows
            accumulate(jnp.where(valid, p, 0.0), jnp.where(valid, prod, 0.0))


def wasserstein_discriminator_loss_cutmix(prediction, label, *,
                                          row_tile=ROW_TILE_DEFAULT):
    """Returns (loss_real, loss_fake) as float32 scalars."""
    assert prediction.shape == label.shape
    n_elems = prediction.size
    inv_n = 1.0 / float(n_elems)

    pred_flat = prediction.reshape(-1)
    label_flat = label.reshape(-1)

    p_isz = prediction.dtype.itemsize
    l_isz = label.dtype.itemsize
    # Sublane-packing constraint on block rows: f32 -> 8, bf16 -> 16, i8 -> 32.
    sub_mult = max(SUBLANES, 32 // min(4, p_isz), 32 // min(4, l_isz))

    tail = n_elems % LANES       # lane-ragged remainder (<128 elements)
    main = n_elems - tail        # lane-aligned prefix handled by the kernel
    rows = main // LANES

    if rows < sub_mult:
        # Tiny tensor: the whole reduction is cheaper than one kernel launch.
        pf = pred_flat.astype(jnp.float32)
        lf = label_flat.astype(jnp.float32)
        s_p = jnp.sum(pf)
        s_pl = jnp.sum(pf * lf)
        loss_real = -s_pl * inv_n
        loss_fake = (s_p - s_pl) * inv_n
        return loss_real, loss_fake

    pred2d = pred_flat[:main].reshape(rows, LANES)
    label2d = label_flat[:main].reshape(rows, LANES)

    # Block row count: multiple of the sublane packing, never larger than rows.
    row_tile = max(sub_mult, (min(row_tile, rows) // sub_mult) * sub_mult)
    num_blocks = -(-rows // row_tile)

    chip_splits, use_core_parallel = _chip_config()
    num_splits = min(chip_splits, num_blocks)
    steps_per_split = -(-num_blocks // num_splits)

    need_clamp = num_splits * steps_per_split > num_blocks
    need_mask = num_splits * steps_per_split * row_tile > rows

    if need_clamp:
        last_block = num_blocks - 1

        def in_map(c, i):
            return (jnp.minimum(c * steps_per_split + i, last_block), 0)
    else:
        def in_map(c, i):
            return (c * steps_per_split + i, 0)

    kernel = functools.partial(
        _wloss_kernel, rows=rows, row_tile=row_tile,
        steps_per_split=steps_per_split, need_mask=need_mask)

    out_struct = jax.ShapeDtypeStruct((num_splits * SUBLANES, LANES),
                                      jnp.float32)
    out_spec = pl.BlockSpec((SUBLANES, LANES), lambda c, i: (c, 0))

    if use_core_parallel and num_splits > 1:
        dim_sem = (getattr(pltpu, "CORE_PARALLEL", "parallel"),
                   getattr(pltpu, "ARBITRARY", "arbitrary"))
    else:
        dim_sem = ("arbitrary", "arbitrary")

    # Scoped-VMEM budget: double-buffered input blocks + generous headroom for
    # in-kernel temporaries (matters on v5e where the default limit is 16 MiB).
    in_dbuf_bytes = 2 * row_tile * LANES * (p_isz + l_isz)
    vmem_limit = int(max(32 << 20, in_dbuf_bytes + (16 << 20)))

    cost = pl.CostEstimate(
        flops=3 * main,
        transcendentals=0,
        bytes_accessed=main * (p_isz + l_isz)
        + 2 * num_splits * SUBLANES * LANES * 4)

    sums_pl, sums_p = pl.pallas_call(
        kernel,
        out_shape=(out_struct, out_struct),
        grid_spec=pltpu.PrefetchScalarGridSpec(
            num_scalar_prefetch=0,
            grid=(num_splits, steps_per_split),
            in_specs=[
                pl.BlockSpec((row_tile, LANES), in_map),
                pl.BlockSpec((row_tile, LANES), in_map),
            ],
            out_specs=[out_spec, out_spec],
        ),
        compiler_params=pltpu.CompilerParams(
            dimension_semantics=dim_sem,
            vmem_limit_bytes=vmem_limit),
        cost_estimate=cost,
    )(pred2d, label2d)

    # Tiny one-time epilogue in plain JAX.
    s_pl = jnp.sum(sums_pl)   # sum(prediction * label)
    s_p = jnp.sum(sums_p)     # sum(prediction)

    if tail:
        # Lane-ragged remainder: reduce the <128-element tail directly
        # (no full-tensor jnp.pad copy).
        tp = pred_flat[main:].astype(jnp.float32)
        tl = label_flat[main:].astype(jnp.float32)
        s_p = s_p + jnp.sum(tp)
        s_pl = s_pl + jnp.sum(tp * tl)

    loss_real = -s_pl * inv_n
    # Algebraically exact; mild cancellation possible when label ~ all ones,
    # acceptable at f32 tolerances.
    loss_fake = (s_p - s_pl) * inv_n
    return loss_real, loss_fake


if __name__ == "__main__":
    loss_fn = jax.jit(wasserstein_discriminator_loss_cutmix,
                      static_argnames=("row_tile",))

    def run_case(shape, label_dtype=jnp.float32, **kwargs):
        key = jax.random.PRNGKey(0)
        k_pred, k_lab = jax.random.split(key)
        prediction = jax.random.normal(k_pred, shape, dtype=jnp.float32)
        # CutMix label: per-pixel 0/1 mask.
        label = (jax.random.uniform(k_lab, shape) > 0.5).astype(label_dtype)

        loss_real, loss_fake = loss_fn(prediction, label, **kwargs)
        jax.block_until_ready((loss_real, loss_fake))

        label32 = label.astype(jnp.float32)
        ref_real = -jnp.mean(prediction * label32)
        ref_fake = jnp.mean(prediction * (1.0 - label32))
        assert jnp.allclose(loss_real, ref_real, atol=1e-5, rtol=1e-5), \
            (shape, loss_real, ref_real)
        assert jnp.allclose(loss_fake, ref_fake, atol=1e-5, rtol=1e-5), \
            (shape, loss_fake, ref_fake)

    # Main small case (NCHW pixel-wise discriminator map): single-block path.
    run_case((2, 1, 32, 32))
    # Multi-block path: small row tile -> ragged last block (and clamped
    # duplicate step when the core split does not divide evenly).
    run_case((2, 3, 24, 32), row_tile=8)
    # Kernel + lane-ragged tail (no jnp.pad): 4641 = 36*128 + 33.
    run_case((3, 7, 13, 17))
    # bf16 label stream (sublane constraint -> row_tile multiple of 16).
    run_case((2, 4, 16, 16), label_dtype=jnp.bfloat16)
    # Tiny-tensor fallback path (< 8 full lanes).
    run_case((2, 1, 5, 13))

    print("KERNEL_OK")
</pallas_src>

<mosaic_0001>
module attributes {stable_mosaic.version = 11 : i64} {
  func.func @_wloss_kernel(%arg0: i32, %arg1: i32, %arg2: memref<16x128xf32, #tpu.memory_space<vmem>>, %arg3: memref<16x128xf32, #tpu.memory_space<vmem>>, %arg4: memref<8x128xf32, #tpu.memory_space<vmem>>, %arg5: memref<8x128xf32, #tpu.memory_space<vmem>>) attributes {dimension_semantics = [#tpu.dimension_semantics<arbitrary>, #tpu.dimension_semantics<arbitrary>], iteration_bounds = array<i64: 1, 1>, scalar_prefetch = 0 : i64, scratch_operands = 0 : i64, tpu.core_type = #tpu.core_type<tc>, window_params = [{transform_indices = @transform_0, window_bounds = array<i64: 16, 128>}, {transform_indices = @transform_1, window_bounds = array<i64: 16, 128>}, {transform_indices = @transform_2, window_bounds = array<i64: 8, 128>}, {transform_indices = @transform_3, window_bounds = array<i64: 8, 128>}]} {
    %c0_i32 = arith.constant 0 : i32
    %0 = arith.cmpi eq, %arg1, %c0_i32 : i32
    %1 = arith.extui %0 : i1 to i32
    %c0_i32_0 = arith.constant 0 : i32
    %2 = arith.cmpi ne, %1, %c0_i32_0 : i32
    scf.if %2 {
      %cst_13 = arith.constant 0.000000e+00 : f32
      %16 = vector.broadcast %cst_13 : f32 to vector<8x128xf32>
      %c0_14 = arith.constant 0 : index
      %c0_15 = arith.constant 0 : index
      %17 = vector.load %arg4[%c0_14, %c0_15] : memref<8x128xf32, #tpu.memory_space<vmem>>, vector<8x128xf32>
      tpu.vector_store %arg4[%c0_14, %c0_15], %16 {strides = array<i32>} : memref<8x128xf32, #tpu.memory_space<vmem>>, vector<8x128xf32>,
      %cst_16 = arith.constant 0.000000e+00 : f32
      %18 = vector.broadcast %cst_16 : f32 to vector<8x128xf32>
      %c0_17 = arith.constant 0 : index
      %c0_18 = arith.constant 0 : index
      %19 = vector.load %arg5[%c0_17, %c0_18] : memref<8x128xf32, #tpu.memory_space<vmem>>, vector<8x128xf32>
      tpu.vector_store %arg5[%c0_17, %c0_18], %18 {strides = array<i32>} : memref<8x128xf32, #tpu.memory_space<vmem>>, vector<8x128xf32>,
    } else {
    }
    %c0 = arith.constant 0 : index
    %c0_1 = arith.constant 0 : index
    %3 = vector.load %arg2[%c0, %c0_1] : memref<16x128xf32, #tpu.memory_space<vmem>>, vector<16x128xf32>
    %c0_2 = arith.constant 0 : index
    %c0_3 = arith.constant 0 : index
    %4 = vector.load %arg3[%c0_2, %c0_3] : memref<16x128xf32, #tpu.memory_space<vmem>>, vector<16x128xf32>
    %5 = arith.mulf %3, %4 : vector<16x128xf32>
    %c0_4 = arith.constant 0 : index
    %c0_5 = arith.constant 0 : index
    %6 = vector.load %arg4[%c0_4, %c0_5] : memref<8x128xf32, #tpu.memory_space<vmem>>, vector<8x128xf32>
    %7 = vector.shape_cast %5 : vector<16x128xf32> to vector<2x8x128xf32>
    %cst = arith.constant dense<0.000000e+00> : vector<8x128xf32>
    %8 = vector.multi_reduction <add>, %7, %cst [0] : vector<2x8x128xf32> to vector<8x128xf32>
    %9 = arith.addf %6, %8 : vector<8x128xf32>
    %c0_6 = arith.constant 0 : index
    %c0_7 = arith.constant 0 : index
    %10 = vector.load %arg4[%c0_6, %c0_7] : memref<8x128xf32, #tpu.memory_space<vmem>>, vector<8x128xf32>
    tpu.vector_store %arg4[%c0_6, %c0_7], %9 {strides = array<i32>} : memref<8x128xf32, #tpu.memory_space<vmem>>, vector<8x128xf32>,
    %c0_8 = arith.constant 0 : index
    %c0_9 = arith.constant 0 : index
    %11 = vector.load %arg5[%c0_8, %c0_9] : memref<8x128xf32, #tpu.memory_space<vmem>>, vector<8x128xf32>
    %12 = vector.shape_cast %3 : vector<16x128xf32> to vector<2x8x128xf32>
    %cst_10 = arith.constant dense<0.000000e+00> : vector<8x128xf32>
    %13 = vector.multi_reduction <add>, %12, %cst_10 [0] : vector<2x8x128xf32> to vector<8x128xf32>
    %14 = arith.addf %11, %13 : vector<8x128xf32>
    %c0_11 = arith.constant 0 : index
    %c0_12 = arith.constant 0 : index
    %15 = vector.load %arg5[%c0_11, %c0_12] : memref<8x128xf32, #tpu.memory_space<vmem>>, vector<8x128xf32>
    tpu.vector_store %arg5[%c0_11, %c0_12], %14 {strides = array<i32>} : memref<8x128xf32, #tpu.memory_space<vmem>>, vector<8x128xf32>,
    return
  }
  func.func @transform_0(%arg0: i32, %arg1: i32) -> (i32, i32) {
    %c1_i32 = arith.constant 1 : i32
    %0 = arith.muli %arg0, %c1_i32 : i32
    %1 = arith.addi %0, %arg1 : i32
    %c0_i32 = arith.constant 0 : i32
    %c0_i32_0 = arith.constant 0 : i32
    return %1, %c0_i32 : i32, i32
  }
  func.func @transform_1(%arg0: i32, %arg1: i32) -> (i32, i32) {
    %c1_i32 = arith.constant 1 : i32
    %0 = arith.muli %arg0, %c1_i32 : i32
    %1 = arith.addi %0, %arg1 : i32
    %c0_i32 = arith.constant 0 : i32
    %c0_i32_0 = arith.constant 0 : i32
    return %1, %c0_i32 : i32, i32
  }
  func.func @transform_2(%arg0: i32, %arg1: i32) -> (i32, i32) {
    %c0_i32 = arith.constant 0 : i32
    %c0_i32_0 = arith.constant 0 : i32
    return %arg0, %c0_i32 : i32, i32
  }
  func.func @transform_3(%arg0: i32, %arg1: i32) -> (i32, i32) {
    %c0_i32 = arith.constant 0 : i32
    %c0_i32_0 = arith.constant 0 : i32
    return %arg0, %c0_i32 : i32, i32
  }
}

</mosaic_0001>

<bundles_post_ra>
// kernel: wasserstein_discriminator_loss_cutmix.1
= control target key start
LH: loop header
LB: loop body
LE: loop exit
PB: predicated region body
PF: predicated region fallthrough
CT: control target
= control target key end

     0   :  { %s136_s0 = inlined_call_operand.vmem [shape: f32[16,128], index: 0, kind: input, shape index: {}]   ;;  %s137_s1 = inlined_call_operand.vmem [shape: f32[16,128], index: 1, kind: input, shape index: {}]   ;;  %s138_s3 = inlined_call_operand.vmem [shape: f32[8,128], index: 3, kind: output, shape index: {1}]   ;;  %s139_s2 = inlined_call_operand.vmem [shape: f32[8,128], index: 2, kind: output, shape index: {0}]  }
   0x1   :  { %v63_v0 = vld [vmem:[%s136_s0] sm:$0xff]  ;;  %v64_v1 = vld [vmem:[%s136_s0 + $0x8] sm:$0xff] }
   0x2   :  { %v65_v2 = vld [vmem:[%s137_s1] sm:$0xff]  ;;  %v66_v3 = vld [vmem:[%s137_s1 + $0x8] sm:$0xff]  ;;  %v74_v5 = vadd.f32 %v64_v1, %v63_v0 }
   0x3   :  { %v67_v4 = vmul.f32 %v65_v2, %v63_v0  ;;  %v68_v6 = vmul.f32 %v66_v3, %v64_v1 }
   0x4   :  { %76 = vst [vmem:[%s138_s3] sm:$0xff] %v74_v5 }
   0x5   :  { %v70_v7 = vadd.f32 %v68_v6, %v67_v4 }
   0x7   :  { %72 = vst [vmem:[%s139_s2] sm:$0xff] %v70_v7 }

</bundles_post_ra>
